<compile_context>
chip_gen: v7x
topology: tpu7x:2x2x1
jax: 0.10.0
libtpu: 0.0.40
codegen_flags: <defaults>
</compile_context>

<pallas_src>
import functools

import jax
import jax.numpy as jnp
from jax import lax
from jax.experimental import pallas as pl
from jax.experimental.pallas import tpu as pltpu


def _round_up(x, m):
    return (x + m - 1) // m * m


def _fasttext_kernel(ids_ref, emb_ref, wt_ref, bias_ref, out_ref, acc_ref,
                     *, seq_len, batch_tile):
    """One grid step = one tile of `batch_tile` batch rows.

    ids_ref  : (B_pad * S,) int32 scalar-prefetch ref in SMEM
    emb_ref  : (Vp, Dp) f32    VMEM-resident embedding table
    wt_ref   : (Dp, Cp) f32    fc weight, pre-transposed (D, C)
    bias_ref : (1, Cp)  f32    fc bias
    out_ref  : (TB, Cp) f32    logits for this batch tile
    acc_ref  : (TB, Dp) f32    pooled embeddings scratch (VMEM)
    """
    tile = pl.program_id(0)
    base = tile * (batch_tile * seq_len)
    inv_s = jnp.float32(1.0 / seq_len)
    dp = acc_ref.shape[1]

    # Gather + mean-pool, one batch row at a time (static unroll over the small
    # batch tile; dynamic-row VMEM loads for the token gather, f32 accumulate).
    for b in range(batch_tile):
        row0 = base + b * seq_len

        def body(s, carry):
            tok = ids_ref[row0 + s]
            return carry + emb_ref[pl.ds(tok, 1), :].astype(jnp.float32)

        row_sum = lax.fori_loop(0, seq_len, body,
                                jnp.zeros((1, dp), jnp.float32), unroll=True)
        acc_ref[b:b + 1, :] = row_sum * inv_s          # fold 1/S into the store

    # One batched, lane-dense fc matmul for the whole tile (MXU-friendly M=TB).
    logits = jnp.dot(acc_ref[...], wt_ref[...],
                     preferred_element_type=jnp.float32) + bias_ref[...]
    out_ref[...] = logits.astype(out_ref.dtype)


def prepare_params(emb_table, fc_w, fc_b):
    """Pad / transpose parameters ONCE (hoisted out of the per-call path)."""
    V, D = emb_table.shape
    C = fc_w.shape[0]
    Vp = _round_up(V, 8)
    Dp = _round_up(D, 128)
    Cp = _round_up(C, 128)

    emb_p = jnp.zeros((Vp, Dp), jnp.float32).at[:V, :D].set(
        emb_table.astype(jnp.float32))
    wt_p = jnp.zeros((Dp, Cp), jnp.float32).at[:D, :C].set(
        jnp.transpose(fc_w).astype(jnp.float32))        # (D, C): no in-kernel .T
    bias_p = jnp.zeros((1, Cp), jnp.float32).at[:, :C].set(
        jnp.reshape(fc_b, (1, C)).astype(jnp.float32))
    return emb_p, wt_p, bias_p


@functools.partial(jax.jit,
                   static_argnames=("vocab_size", "num_classes", "batch_tile"))
def fasttext_forward(ids, emb_p, wt_p, bias_p, *, vocab_size, num_classes,
                     batch_tile=8):
    """ids: (B, S) int; padded params from prepare_params -> (B, C) f32."""
    B, S = ids.shape
    Vp, Dp = emb_p.shape
    Cp = wt_p.shape[1]
    TB = batch_tile
    B_pad = _round_up(B, TB)
    nbt = B_pad // TB

    # Clamp token ids (nn.Embedding would reject OOB ids; never index OOB here),
    # cast to int32, pad the batch to a multiple of the tile, flatten for SMEM.
    ids = jnp.clip(ids.astype(jnp.int32), 0, vocab_size - 1)
    ids_pad = jnp.zeros((B_pad, S), jnp.int32).at[:B, :].set(ids)
    ids_flat = ids_pad.reshape(-1)

    # VMEM budget check for the resident-table design (double-buffered inputs).
    table_bytes = Vp * Dp * 4
    weight_bytes = Dp * Cp * 4
    vmem_need = (2 * (table_bytes + weight_bytes)     # table + fc weight (x2 bufs)
                 + 2 * TB * Cp * 4                    # output tile (x2 bufs)
                 + TB * Dp * 4                        # acc scratch
                 + 2 * Cp * 4)                        # bias (x2 bufs)
    # ~40 MiB keeps headroom even on v7x (64 MiB physical VMEM).
    assert vmem_need <= 40 * 1024 * 1024, (
        "embedding table too large for the VMEM-resident kernel; "
        "use the streaming DMA-gather variant")  # TODO(synk): implement it
    vmem_limit = max(32 * 1024 * 1024, vmem_need + (4 << 20))

    kernel = functools.partial(_fasttext_kernel, seq_len=S, batch_tile=TB)

    cost = pl.CostEstimate(
        flops=2 * B_pad * Dp * Cp + B_pad * S * Dp,
        transcendentals=0,
        bytes_accessed=(table_bytes + weight_bytes + Cp * 4
                        + B_pad * S * 4 + B_pad * Cp * 4),
    )

    out_p = pl.pallas_call(
        kernel,
        out_shape=jax.ShapeDtypeStruct((B_pad, Cp), jnp.float32),
        grid_spec=pltpu.PrefetchScalarGridSpec(
            num_scalar_prefetch=1,
            grid=(nbt,),
            in_specs=[
                # Embedding table: constant block, fetched once, stays in VMEM.
                pl.BlockSpec((Vp, Dp), lambda i, ids_sref: (0, 0)),
                # fc weight / bias: constant blocks, fetched once.
                pl.BlockSpec((Dp, Cp), lambda i, ids_sref: (0, 0)),
                pl.BlockSpec((1, Cp), lambda i, ids_sref: (0, 0)),
            ],
            out_specs=pl.BlockSpec((TB, Cp), lambda i, ids_sref: (i, 0)),
            scratch_shapes=[pltpu.VMEM((TB, Dp), jnp.float32)],
        ),
        compiler_params=pltpu.CompilerParams(
            # Single batch-tile axis: "parallel" lets v7x's two TensorCores
            # split the tiles; neutral on single-TC v5e/v6e.
            dimension_semantics=("parallel",),
            vmem_limit_bytes=vmem_limit,
        ),
        cost_estimate=cost,
    )(ids_flat, emb_p, wt_p, bias_p)

    return out_p[:B, :num_classes]


if __name__ == "__main__":
    # Small shapes consistent with the module.
    B, S = 2, 8            # batch, sequence length
    VOCAB = 32
    EMB_DIM = 32
    NUM_CLASSES = 8

    key = jax.random.PRNGKey(0)
    k_ids, k_emb, k_w, k_b = jax.random.split(key, 4)

    ids = jax.random.randint(k_ids, (B, S), 0, VOCAB, dtype=jnp.int32)
    emb_table = jax.random.normal(k_emb, (VOCAB, EMB_DIM), dtype=jnp.float32) * 0.1
    fc_w = jax.random.normal(k_w, (NUM_CLASSES, EMB_DIM), dtype=jnp.float32) * 0.1
    fc_b = jax.random.normal(k_b, (NUM_CLASSES,), dtype=jnp.float32) * 0.1

    # Padding / transpose done once, outside the per-call path.
    emb_p, wt_p, bias_p = prepare_params(emb_table, fc_w, fc_b)

    out = fasttext_forward(ids, emb_p, wt_p, bias_p,
                           vocab_size=VOCAB, num_classes=NUM_CLASSES)
    out = jax.block_until_ready(out)

    # Pure-JAX reference (embedding gather -> mean -> linear).
    ref = jnp.take(emb_table, ids, axis=0).mean(axis=1) @ fc_w.T + fc_b
    assert out.shape == (B, NUM_CLASSES)
    assert jnp.allclose(out, ref, atol=1e-5, rtol=1e-5), (out, ref)

    print("KERNEL_OK")
</pallas_src>

<mosaic_0001>
module attributes {stable_mosaic.version = 11 : i64} {
  func.func @_fasttext_kernel(%arg0: i32, %arg1: memref<64xi32, #tpu.memory_space<smem>>, %arg2: memref<32x128xf32, #tpu.memory_space<vmem>>, %arg3: memref<128x128xf32, #tpu.memory_space<vmem>>, %arg4: memref<1x128xf32, #tpu.memory_space<vmem>>, %arg5: memref<8x128xf32, #tpu.memory_space<vmem>>, %arg6: memref<8x128xf32, #tpu.memory_space<vmem>>) attributes {dimension_semantics = [#tpu.dimension_semantics<parallel>], iteration_bounds = array<i64: 1>, scalar_prefetch = 1 : i64, scratch_operands = 1 : i64, tpu.core_type = #tpu.core_type<tc>, window_params = [{pipeline_mode = #tpu.pipeline_mode<synchronous>, transform_indices = @transform_0, window_bounds = array<i64: 32, 128>}, {pipeline_mode = #tpu.pipeline_mode<synchronous>, transform_indices = @transform_1, window_bounds = array<i64: 128, 128>}, {pipeline_mode = #tpu.pipeline_mode<synchronous>, transform_indices = @transform_2, window_bounds = array<i64: 1, 128>}, {transform_indices = @transform_3, window_bounds = array<i64: 8, 128>}]} {
    %c64_i32 = arith.constant 64 : i32
    %0 = arith.muli %arg0, %c64_i32 : i32
    %c0_i32 = arith.constant 0 : i32
    %1 = arith.addi %0, %c0_i32 : i32
    %cst = arith.constant 0.000000e+00 : f32
    %2 = vector.broadcast %cst : f32 to vector<1x128xf32>
    %c0_i32_0 = arith.constant 0 : i32
    %3 = arith.addi %1, %c0_i32_0 : i32
    %4 = arith.index_cast %3 : i32 to index
    %5 = memref.load %arg1[%4] : memref<64xi32, #tpu.memory_space<smem>>
    %6 = arith.index_cast %5 : i32 to index
    %c0 = arith.constant 0 : index
    %7 = vector.load %arg2[%6, %c0] : memref<32x128xf32, #tpu.memory_space<vmem>>, vector<1x128xf32>
    %8 = arith.addf %2, %7 : vector<1x128xf32>
    %c1_i32 = arith.constant 1 : i32
    %9 = arith.addi %1, %c1_i32 : i32
    %10 = arith.index_cast %9 : i32 to index
    %11 = memref.load %arg1[%10] : memref<64xi32, #tpu.memory_space<smem>>
    %12 = arith.index_cast %11 : i32 to index
    %c0_1 = arith.constant 0 : index
    %13 = vector.load %arg2[%12, %c0_1] : memref<32x128xf32, #tpu.memory_space<vmem>>, vector<1x128xf32>
    %14 = arith.addf %8, %13 : vector<1x128xf32>
    %c2_i32 = arith.constant 2 : i32
    %15 = arith.addi %1, %c2_i32 : i32
    %16 = arith.index_cast %15 : i32 to index
    %17 = memref.load %arg1[%16] : memref<64xi32, #tpu.memory_space<smem>>
    %18 = arith.index_cast %17 : i32 to index
    %c0_2 = arith.constant 0 : index
    %19 = vector.load %arg2[%18, %c0_2] : memref<32x128xf32, #tpu.memory_space<vmem>>, vector<1x128xf32>
    %20 = arith.addf %14, %19 : vector<1x128xf32>
    %c3_i32 = arith.constant 3 : i32
    %21 = arith.addi %1, %c3_i32 : i32
    %22 = arith.index_cast %21 : i32 to index
    %23 = memref.load %arg1[%22] : memref<64xi32, #tpu.memory_space<smem>>
    %24 = arith.index_cast %23 : i32 to index
    %c0_3 = arith.constant 0 : index
    %25 = vector.load %arg2[%24, %c0_3] : memref<32x128xf32, #tpu.memory_space<vmem>>, vector<1x128xf32>
    %26 = arith.addf %20, %25 : vector<1x128xf32>
    %c4_i32 = arith.constant 4 : i32
    %27 = arith.addi %1, %c4_i32 : i32
    %28 = arith.index_cast %27 : i32 to index
    %29 = memref.load %arg1[%28] : memref<64xi32, #tpu.memory_space<smem>>
    %30 = arith.index_cast %29 : i32 to index
    %c0_4 = arith.constant 0 : index
    %31 = vector.load %arg2[%30, %c0_4] : memref<32x128xf32, #tpu.memory_space<vmem>>, vector<1x128xf32>
    %32 = arith.addf %26, %31 : vector<1x128xf32>
    %c5_i32 = arith.constant 5 : i32
    %33 = arith.addi %1, %c5_i32 : i32
    %34 = arith.index_cast %33 : i32 to index
    %35 = memref.load %arg1[%34] : memref<64xi32, #tpu.memory_space<smem>>
    %36 = arith.index_cast %35 : i32 to index
    %c0_5 = arith.constant 0 : index
    %37 = vector.load %arg2[%36, %c0_5] : memref<32x128xf32, #tpu.memory_space<vmem>>, vector<1x128xf32>
    %38 = arith.addf %32, %37 : vector<1x128xf32>
    %c6_i32 = arith.constant 6 : i32
    %39 = arith.addi %1, %c6_i32 : i32
    %40 = arith.index_cast %39 : i32 to index
    %41 = memref.load %arg1[%40] : memref<64xi32, #tpu.memory_space<smem>>
    %42 = arith.index_cast %41 : i32 to index
    %c0_6 = arith.constant 0 : index
    %43 = vector.load %arg2[%42, %c0_6] : memref<32x128xf32, #tpu.memory_space<vmem>>, vector<1x128xf32>
    %44 = arith.addf %38, %43 : vector<1x128xf32>
    %c7_i32 = arith.constant 7 : i32
    %45 = arith.addi %1, %c7_i32 : i32
    %46 = arith.index_cast %45 : i32 to index
    %47 = memref.load %arg1[%46] : memref<64xi32, #tpu.memory_space<smem>>
    %48 = arith.index_cast %47 : i32 to index
    %c0_7 = arith.constant 0 : index
    %49 = vector.load %arg2[%48, %c0_7] : memref<32x128xf32, #tpu.memory_space<vmem>>, vector<1x128xf32>
    %50 = arith.addf %44, %49 : vector<1x128xf32>
    %c8_i32 = arith.constant 8 : i32
    %cst_8 = arith.constant 1.250000e-01 : f32
    %51 = vector.broadcast %cst_8 : f32 to vector<1x128xf32>
    %52 = arith.mulf %50, %51 : vector<1x128xf32>
    %c0_9 = arith.constant 0 : index
    %c0_10 = arith.constant 0 : index
    %53 = vector.load %arg6[%c0_9, %c0_10] : memref<8x128xf32, #tpu.memory_space<vmem>>, vector<1x128xf32>
    tpu.vector_store %arg6[%c0_9, %c0_10], %52 {strides = array<i32>} : memref<8x128xf32, #tpu.memory_space<vmem>>, vector<1x128xf32>,
    %c8_i32_11 = arith.constant 8 : i32
    %54 = arith.addi %0, %c8_i32_11 : i32
    %cst_12 = arith.constant 0.000000e+00 : f32
    %55 = vector.broadcast %cst_12 : f32 to vector<1x128xf32>
    %c0_i32_13 = arith.constant 0 : i32
    %56 = arith.addi %54, %c0_i32_13 : i32
    %57 = arith.index_cast %56 : i32 to index
    %58 = memref.load %arg1[%57] : memref<64xi32, #tpu.memory_space<smem>>
    %59 = arith.index_cast %58 : i32 to index
    %c0_14 = arith.constant 0 : index
    %60 = vector.load %arg2[%59, %c0_14] : memref<32x128xf32, #tpu.memory_space<vmem>>, vector<1x128xf32>
    %61 = arith.addf %55, %60 : vector<1x128xf32>
    %c1_i32_15 = arith.constant 1 : i32
    %62 = arith.addi %54, %c1_i32_15 : i32
    %63 = arith.index_cast %62 : i32 to index
    %64 = memref.load %arg1[%63] : memref<64xi32, #tpu.memory_space<smem>>
    %65 = arith.index_cast %64 : i32 to index
    %c0_16 = arith.constant 0 : index
    %66 = vector.load %arg2[%65, %c0_16] : memref<32x128xf32, #tpu.memory_space<vmem>>, vector<1x128xf32>
    %67 = arith.addf %61, %66 : vector<1x128xf32>
    %c2_i32_17 = arith.constant 2 : i32
    %68 = arith.addi %54, %c2_i32_17 : i32
    %69 = arith.index_cast %68 : i32 to index
    %70 = memref.load %arg1[%69] : memref<64xi32, #tpu.memory_space<smem>>
    %71 = arith.index_cast %70 : i32 to index
    %c0_18 = arith.constant 0 : index
    %72 = vector.load %arg2[%71, %c0_18] : memref<32x128xf32, #tpu.memory_space<vmem>>, vector<1x128xf32>
    %73 = arith.addf %67, %72 : vector<1x128xf32>
    %c3_i32_19 = arith.constant 3 : i32
    %74 = arith.addi %54, %c3_i32_19 : i32
    %75 = arith.index_cast %74 : i32 to index
    %76 = memref.load %arg1[%75] : memref<64xi32, #tpu.memory_space<smem>>
    %77 = arith.index_cast %76 : i32 to index
    %c0_20 = arith.constant 0 : index
    %78 = vector.load %arg2[%77, %c0_20] : memref<32x128xf32, #tpu.memory_space<vmem>>, vector<1x128xf32>
    %79 = arith.addf %73, %78 : vector<1x128xf32>
    %c4_i32_21 = arith.constant 4 : i32
    %80 = arith.addi %54, %c4_i32_21 : i32
    %81 = arith.index_cast %80 : i32 to index
    %82 = memref.load %arg1[%81] : memref<64xi32, #tpu.memory_space<smem>>
    %83 = arith.index_cast %82 : i32 to index
    %c0_22 = arith.constant 0 : index
    %84 = vector.load %arg2[%83, %c0_22] : memref<32x128xf32, #tpu.memory_space<vmem>>, vector<1x128xf32>
    %85 = arith.addf %79, %84 : vector<1x128xf32>
    %c5_i32_23 = arith.constant 5 : i32
    %86 = arith.addi %54, %c5_i32_23 : i32
    %87 = arith.index_cast %86 : i32 to index
    %88 = memref.load %arg1[%87] : memref<64xi32, #tpu.memory_space<smem>>
    %89 = arith.index_cast %88 : i32 to index
    %c0_24 = arith.constant 0 : index
    %90 = vector.load %arg2[%89, %c0_24] : memref<32x128xf32, #tpu.memory_space<vmem>>, vector<1x128xf32>
    %91 = arith.addf %85, %90 : vector<1x128xf32>
    %c6_i32_25 = arith.constant 6 : i32
    %92 = arith.addi %54, %c6_i32_25 : i32
    %93 = arith.index_cast %92 : i32 to index
    %94 = memref.load %arg1[%93] : memref<64xi32, #tpu.memory_space<smem>>
    %95 = arith.index_cast %94 : i32 to index
    %c0_26 = arith.constant 0 : index
    %96 = vector.load %arg2[%95, %c0_26] : memref<32x128xf32, #tpu.memory_space<vmem>>, vector<1x128xf32>
    %97 = arith.addf %91, %96 : vector<1x128xf32>
    %c7_i32_27 = arith.constant 7 : i32
    %98 = arith.addi %54, %c7_i32_27 : i32
    %99 = arith.index_cast %98 : i32 to index
    %100 = memref.load %arg1[%99] : memref<64xi32, #tpu.memory_space<smem>>
    %101 = arith.index_cast %100 : i32 to index
    %c0_28 = arith.constant 0 : index
    %102 = vector.load %arg2[%101, %c0_28] : memref<32x128xf32, #tpu.memory_space<vmem>>, vector<1x128xf32>
    %103 = arith.addf %97, %102 : vector<1x128xf32>
    %c8_i32_29 = arith.constant 8 : i32
    %cst_30 = arith.constant 1.250000e-01 : f32
    %104 = vector.broadcast %cst_30 : f32 to vector<1x128xf32>
    %105 = arith.mulf %103, %104 : vector<1x128xf32>
    %c1 = arith.constant 1 : index
    %c0_31 = arith.constant 0 : index
    %106 = vector.load %arg6[%c1, %c0_31] : memref<8x128xf32, #tpu.memory_space<vmem>>, vector<1x128xf32>
    tpu.vector_store %arg6[%c1, %c0_31], %105 {strides = array<i32>} : memref<8x128xf32, #tpu.memory_space<vmem>>, vector<1x128xf32>,
    %c16_i32 = arith.constant 16 : i32
    %107 = arith.addi %0, %c16_i32 : i32
    %cst_32 = arith.constant 0.000000e+00 : f32
    %108 = vector.broadcast %cst_32 : f32 to vector<1x128xf32>
    %c0_i32_33 = arith.constant 0 : i32
    %109 = arith.addi %107, %c0_i32_33 : i32
    %110 = arith.index_cast %109 : i32 to index
    %111 = memref.load %arg1[%110] : memref<64xi32, #tpu.memory_space<smem>>
    %112 = arith.index_cast %111 : i32 to index
    %c0_34 = arith.constant 0 : index
    %113 = vector.load %arg2[%112, %c0_34] : memref<32x128xf32, #tpu.memory_space<vmem>>, vector<1x128xf32>
    %114 = arith.addf %108, %113 : vector<1x128xf32>
    %c1_i32_35 = arith.constant 1 : i32
    %115 = arith.addi %107, %c1_i32_35 : i32
    %116 = arith.index_cast %115 : i32 to index
    %117 = memref.load %arg1[%116] : memref<64xi32, #tpu.memory_space<smem>>
    %118 = arith.index_cast %117 : i32 to index
    %c0_36 = arith.constant 0 : index
    %119 = vector.load %arg2[%118, %c0_36] : memref<32x128xf32, #tpu.memory_space<vmem>>, vector<1x128xf32>
    %120 = arith.addf %114, %119 : vector<1x128xf32>
    %c2_i32_37 = arith.constant 2 : i32
    %121 = arith.addi %107, %c2_i32_37 : i32
    %122 = arith.index_cast %121 : i32 to index
    %123 = memref.load %arg1[%122] : memref<64xi32, #tpu.memory_space<smem>>
    %124 = arith.index_cast %123 : i32 to index
    %c0_38 = arith.constant 0 : index
    %125 = vector.load %arg2[%124, %c0_38] : memref<32x128xf32, #tpu.memory_space<vmem>>, vector<1x128xf32>
    %126 = arith.addf %120, %125 : vector<1x128xf32>
    %c3_i32_39 = arith.constant 3 : i32
    %127 = arith.addi %107, %c3_i32_39 : i32
    %128 = arith.index_cast %127 : i32 to index
    %129 = memref.load %arg1[%128] : memref<64xi32, #tpu.memory_space<smem>>
    %130 = arith.index_cast %129 : i32 to index
    %c0_40 = arith.constant 0 : index
    %131 = vector.load %arg2[%130, %c0_40] : memref<32x128xf32, #tpu.memory_space<vmem>>, vector<1x128xf32>
    %132 = arith.addf %126, %131 : vector<1x128xf32>
    %c4_i32_41 = arith.constant 4 : i32
    %133 = arith.addi %107, %c4_i32_41 : i32
    %134 = arith.index_cast %133 : i32 to index
    %135 = memref.load %arg1[%134] : memref<64xi32, #tpu.memory_space<smem>>
    %136 = arith.index_cast %135 : i32 to index
    %c0_42 = arith.constant 0 : index
    %137 = vector.load %arg2[%136, %c0_42] : memref<32x128xf32, #tpu.memory_space<vmem>>, vector<1x128xf32>
    %138 = arith.addf %132, %137 : vector<1x128xf32>
    %c5_i32_43 = arith.constant 5 : i32
    %139 = arith.addi %107, %c5_i32_43 : i32
    %140 = arith.index_cast %139 : i32 to index
    %141 = memref.load %arg1[%140] : memref<64xi32, #tpu.memory_space<smem>>
    %142 = arith.index_cast %141 : i32 to index
    %c0_44 = arith.constant 0 : index
    %143 = vector.load %arg2[%142, %c0_44] : memref<32x128xf32, #tpu.memory_space<vmem>>, vector<1x128xf32>
    %144 = arith.addf %138, %143 : vector<1x128xf32>
    %c6_i32_45 = arith.constant 6 : i32
    %145 = arith.addi %107, %c6_i32_45 : i32
    %146 = arith.index_cast %145 : i32 to index
    %147 = memref.load %arg1[%146] : memref<64xi32, #tpu.memory_space<smem>>
    %148 = arith.index_cast %147 : i32 to index
    %c0_46 = arith.constant 0 : index
    %149 = vector.load %arg2[%148, %c0_46] : memref<32x128xf32, #tpu.memory_space<vmem>>, vector<1x128xf32>
    %150 = arith.addf %144, %149 : vector<1x128xf32>
    %c7_i32_47 = arith.constant 7 : i32
    %151 = arith.addi %107, %c7_i32_47 : i32
    %152 = arith.index_cast %151 : i32 to index
    %153 = memref.load %arg1[%152] : memref<64xi32, #tpu.memory_space<smem>>
    %154 = arith.index_cast %153 : i32 to index
    %c0_48 = arith.constant 0 : index
    %155 = vector.load %arg2[%154, %c0_48] : memref<32x128xf32, #tpu.memory_space<vmem>>, vector<1x128xf32>
    %156 = arith.addf %150, %155 : vector<1x128xf32>
    %c8_i32_49 = arith.constant 8 : i32
    %cst_50 = arith.constant 1.250000e-01 : f32
    %157 = vector.broadcast %cst_50 : f32 to vector<1x128xf32>
    %158 = arith.mulf %156, %157 : vector<1x128xf32>
    %c2 = arith.constant 2 : index
    %c0_51 = arith.constant 0 : index
    %159 = vector.load %arg6[%c2, %c0_51] : memref<8x128xf32, #tpu.memory_space<vmem>>, vector<1x128xf32>
    tpu.vector_store %arg6[%c2, %c0_51], %158 {strides = array<i32>} : memref<8x128xf32, #tpu.memory_space<vmem>>, vector<1x128xf32>,
    %c24_i32 = arith.constant 24 : i32
    %160 = arith.addi %0, %c24_i32 : i32
    %cst_52 = arith.constant 0.000000e+00 : f32
    %161 = vector.broadcast %cst_52 : f32 to vector<1x128xf32>
    %c0_i32_53 = arith.constant 0 : i32
    %162 = arith.addi %160, %c0_i32_53 : i32
    %163 = arith.index_cast %162 : i32 to index
    %164 = memref.load %arg1[%163] : memref<64xi32, #tpu.memory_space<smem>>
    %165 = arith.index_cast %164 : i32 to index
    %c0_54 = arith.constant 0 : index
    %166 = vector.load %arg2[%165, %c0_54] : memref<32x128xf32, #tpu.memory_space<vmem>>, vector<1x128xf32>
    %167 = arith.addf %161, %166 : vector<1x128xf32>
    %c1_i32_55 = arith.constant 1 : i32
    %168 = arith.addi %160, %c1_i32_55 : i32
    %169 = arith.index_cast %168 : i32 to index
    %170 = memref.load %arg1[%169] : memref<64xi32, #tpu.memory_space<smem>>
    %171 = arith.index_cast %170 : i32 to index
    %c0_56 = arith.constant 0 : index
    %172 = vector.load %arg2[%171, %c0_56] : memref<32x128xf32, #tpu.memory_space<vmem>>, vector<1x128xf32>
    %173 = arith.addf %167, %172 : vector<1x128xf32>
    %c2_i32_57 = arith.constant 2 : i32
    %174 = arith.addi %160, %c2_i32_57 : i32
    %175 = arith.index_cast %174 : i32 to index
    %176 = memref.load %arg1[%175] : memref<64xi32, #tpu.memory_space<smem>>
    %177 = arith.index_cast %176 : i32 to index
    %c0_58 = arith.constant 0 : index
    %178 = vector.load %arg2[%177, %c0_58] : memref<32x128xf32, #tpu.memory_space<vmem>>, vector<1x128xf32>
    %179 = arith.addf %173, %178 : vector<1x128xf32>
    %c3_i32_59 = arith.constant 3 : i32
    %180 = arith.addi %160, %c3_i32_59 : i32
    %181 = arith.index_cast %180 : i32 to index
    %182 = memref.load %arg1[%181] : memref<64xi32, #tpu.memory_space<smem>>
    %183 = arith.index_cast %182 : i32 to index
    %c0_60 = arith.constant 0 : index
    %184 = vector.load %arg2[%183, %c0_60] : memref<32x128xf32, #tpu.memory_space<vmem>>, vector<1x128xf32>
    %185 = arith.addf %179, %184 : vector<1x128xf32>
    %c4_i32_61 = arith.constant 4 : i32
    %186 = arith.addi %160, %c4_i32_61 : i32
    %187 = arith.index_cast %186 : i32 to index
    %188 = memref.load %arg1[%187] : memref<64xi32, #tpu.memory_space<smem>>
    %189 = arith.index_cast %188 : i32 to index
    %c0_62 = arith.constant 0 : index
    %190 = vector.load %arg2[%189, %c0_62] : memref<32x128xf32, #tpu.memory_space<vmem>>, vector<1x128xf32>
    %191 = arith.addf %185, %190 : vector<1x128xf32>
    %c5_i32_63 = arith.constant 5 : i32
    %192 = arith.addi %160, %c5_i32_63 : i32
    %193 = arith.index_cast %192 : i32 to index
    %194 = memref.load %arg1[%193] : memref<64xi32, #tpu.memory_space<smem>>
    %195 = arith.index_cast %194 : i32 to index
    %c0_64 = arith.constant 0 : index
    %196 = vector.load %arg2[%195, %c0_64] : memref<32x128xf32, #tpu.memory_space<vmem>>, vector<1x128xf32>
    %197 = arith.addf %191, %196 : vector<1x128xf32>
    %c6_i32_65 = arith.constant 6 : i32
    %198 = arith.addi %160, %c6_i32_65 : i32
    %199 = arith.index_cast %198 : i32 to index
    %200 = memref.load %arg1[%199] : memref<64xi32, #tpu.memory_space<smem>>
    %201 = arith.index_cast %200 : i32 to index
    %c0_66 = arith.constant 0 : index
    %202 = vector.load %arg2[%201, %c0_66] : memref<32x128xf32, #tpu.memory_space<vmem>>, vector<1x128xf32>
    %203 = arith.addf %197, %202 : vector<1x128xf32>
    %c7_i32_67 = arith.constant 7 : i32
    %204 = arith.addi %160, %c7_i32_67 : i32
    %205 = arith.index_cast %204 : i32 to index
    %206 = memref.load %arg1[%205] : memref<64xi32, #tpu.memory_space<smem>>
    %207 = arith.index_cast %206 : i32 to index
    %c0_68 = arith.constant 0 : index
    %208 = vector.load %arg2[%207, %c0_68] : memref<32x128xf32, #tpu.memory_space<vmem>>, vector<1x128xf32>
    %209 = arith.addf %203, %208 : vector<1x128xf32>
    %c8_i32_69 = arith.constant 8 : i32
    %cst_70 = arith.constant 1.250000e-01 : f32
    %210 = vector.broadcast %cst_70 : f32 to vector<1x128xf32>
    %211 = arith.mulf %209, %210 : vector<1x128xf32>
    %c3 = arith.constant 3 : index
    %c0_71 = arith.constant 0 : index
    %212 = vector.load %arg6[%c3, %c0_71] : memref<8x128xf32, #tpu.memory_space<vmem>>, vector<1x128xf32>
    tpu.vector_store %arg6[%c3, %c0_71], %211 {strides = array<i32>} : memref<8x128xf32, #tpu.memory_space<vmem>>, vector<1x128xf32>,
    %c32_i32 = arith.constant 32 : i32
    %213 = arith.addi %0, %c32_i32 : i32
    %cst_72 = arith.constant 0.000000e+00 : f32
    %214 = vector.broadcast %cst_72 : f32 to vector<1x128xf32>
    %c0_i32_73 = arith.constant 0 : i32
    %215 = arith.addi %213, %c0_i32_73 : i32
    %216 = arith.index_cast %215 : i32 to index
    %217 = memref.load %arg1[%216] : memref<64xi32, #tpu.memory_space<smem>>
    %218 = arith.index_cast %217 : i32 to index
    %c0_74 = arith.constant 0 : index
    %219 = vector.load %arg2[%218, %c0_74] : memref<32x128xf32, #tpu.memory_space<vmem>>, vector<1x128xf32>
    %220 = arith.addf %214, %219 : vector<1x128xf32>
    %c1_i32_75 = arith.constant 1 : i32
    %221 = arith.addi %213, %c1_i32_75 : i32
    %222 = arith.index_cast %221 : i32 to index
    %223 = memref.load %arg1[%222] : memref<64xi32, #tpu.memory_space<smem>>
    %224 = arith.index_cast %223 : i32 to index
    %c0_76 = arith.constant 0 : index
    %225 = vector.load %arg2[%224, %c0_76] : memref<32x128xf32, #tpu.memory_space<vmem>>, vector<1x128xf32>
    %226 = arith.addf %220, %225 : vector<1x128xf32>
    %c2_i32_77 = arith.constant 2 : i32
    %227 = arith.addi %213, %c2_i32_77 : i32
    %228 = arith.index_cast %227 : i32 to index
    %229 = memref.load %arg1[%228] : memref<64xi32, #tpu.memory_space<smem>>
    %230 = arith.index_cast %229 : i32 to index
    %c0_78 = arith.constant 0 : index
    %231 = vector.load %arg2[%230, %c0_78] : memref<32x128xf32, #tpu.memory_space<vmem>>, vector<1x128xf32>
    %232 = arith.addf %226, %231 : vector<1x128xf32>
    %c3_i32_79 = arith.constant 3 : i32
    %233 = arith.addi %213, %c3_i32_79 : i32
    %234 = arith.index_cast %233 : i32 to index
    %235 = memref.load %arg1[%234] : memref<64xi32, #tpu.memory_space<smem>>
    %236 = arith.index_cast %235 : i32 to index
    %c0_80 = arith.constant 0 : index
    %237 = vector.load %arg2[%236, %c0_80] : memref<32x128xf32, #tpu.memory_space<vmem>>, vector<1x128xf32>
    %238 = arith.addf %232, %237 : vector<1x128xf32>
    %c4_i32_81 = arith.constant 4 : i32
    %239 = arith.addi %213, %c4_i32_81 : i32
    %240 = arith.index_cast %239 : i32 to index
    %241 = memref.load %arg1[%240] : memref<64xi32, #tpu.memory_space<smem>>
    %242 = arith.index_cast %241 : i32 to index
    %c0_82 = arith.constant 0 : index
    %243 = vector.load %arg2[%242, %c0_82] : memref<32x128xf32, #tpu.memory_space<vmem>>, vector<1x128xf32>
    %244 = arith.addf %238, %243 : vector<1x128xf32>
    %c5_i32_83 = arith.constant 5 : i32
    %245 = arith.addi %213, %c5_i32_83 : i32
    %246 = arith.index_cast %245 : i32 to index
    %247 = memref.load %arg1[%246] : memref<64xi32, #tpu.memory_space<smem>>
    %248 = arith.index_cast %247 : i32 to index
    %c0_84 = arith.constant 0 : index
    %249 = vector.load %arg2[%248, %c0_84] : memref<32x128xf32, #tpu.memory_space<vmem>>, vector<1x128xf32>
    %250 = arith.addf %244, %249 : vector<1x128xf32>
    %c6_i32_85 = arith.constant 6 : i32
    %251 = arith.addi %213, %c6_i32_85 : i32
    %252 = arith.index_cast %251 : i32 to index
    %253 = memref.load %arg1[%252] : memref<64xi32, #tpu.memory_space<smem>>
    %254 = arith.index_cast %253 : i32 to index
    %c0_86 = arith.constant 0 : index
    %255 = vector.load %arg2[%254, %c0_86] : memref<32x128xf32, #tpu.memory_space<vmem>>, vector<1x128xf32>
    %256 = arith.addf %250, %255 : vector<1x128xf32>
    %c7_i32_87 = arith.constant 7 : i32
    %257 = arith.addi %213, %c7_i32_87 : i32
    %258 = arith.index_cast %257 : i32 to index
    %259 = memref.load %arg1[%258] : memref<64xi32, #tpu.memory_space<smem>>
    %260 = arith.index_cast %259 : i32 to index
    %c0_88 = arith.constant 0 : index
    %261 = vector.load %arg2[%260, %c0_88] : memref<32x128xf32, #tpu.memory_space<vmem>>, vector<1x128xf32>
    %262 = arith.addf %256, %261 : vector<1x128xf32>
    %c8_i32_89 = arith.constant 8 : i32
    %cst_90 = arith.constant 1.250000e-01 : f32
    %263 = vector.broadcast %cst_90 : f32 to vector<1x128xf32>
    %264 = arith.mulf %262, %263 : vector<1x128xf32>
    %c4 = arith.constant 4 : index
    %c0_91 = arith.constant 0 : index
    %265 = vector.load %arg6[%c4, %c0_91] : memref<8x128xf32, #tpu.memory_space<vmem>>, vector<1x128xf32>
    tpu.vector_store %arg6[%c4, %c0_91], %264 {strides = array<i32>} : memref<8x128xf32, #tpu.memory_space<vmem>>, vector<1x128xf32>,
    %c40_i32 = arith.constant 40 : i32
    %266 = arith.addi %0, %c40_i32 : i32
    %cst_92 = arith.constant 0.000000e+00 : f32
    %267 = vector.broadcast %cst_92 : f32 to vector<1x128xf32>
    %c0_i32_93 = arith.constant 0 : i32
    %268 = arith.addi %266, %c0_i32_93 : i32
    %269 = arith.index_cast %268 : i32 to index
    %270 = memref.load %arg1[%269] : memref<64xi32, #tpu.memory_space<smem>>
    %271 = arith.index_cast %270 : i32 to index
    %c0_94 = arith.constant 0 : index
    %272 = vector.load %arg2[%271, %c0_94] : memref<32x128xf32, #tpu.memory_space<vmem>>, vector<1x128xf32>
    %273 = arith.addf %267, %272 : vector<1x128xf32>
    %c1_i32_95 = arith.constant 1 : i32
    %274 = arith.addi %266, %c1_i32_95 : i32
    %275 = arith.index_cast %274 : i32 to index
    %276 = memref.load %arg1[%275] : memref<64xi32, #tpu.memory_space<smem>>
    %277 = arith.index_cast %276 : i32 to index
    %c0_96 = arith.constant 0 : index
    %278 = vector.load %arg2[%277, %c0_96] : memref<32x128xf32, #tpu.memory_space<vmem>>, vector<1x128xf32>
    %279 = arith.addf %273, %278 : vector<1x128xf32>
    %c2_i32_97 = arith.constant 2 : i32
    %280 = arith.addi %266, %c2_i32_97 : i32
    %281 = arith.index_cast %280 : i32 to index
    %282 = memref.load %arg1[%281] : memref<64xi32, #tpu.memory_space<smem>>
    %283 = arith.index_cast %282 : i32 to index
    %c0_98 = arith.constant 0 : index
    %284 = vector.load %arg2[%283, %c0_98] : memref<32x128xf32, #tpu.memory_space<vmem>>, vector<1x128xf32>
    %285 = arith.addf %279, %284 : vector<1x128xf32>
    %c3_i32_99 = arith.constant 3 : i32
    %286 = arith.addi %266, %c3_i32_99 : i32
    %287 = arith.index_cast %286 : i32 to index
    %288 = memref.load %arg1[%287] : memref<64xi32, #tpu.memory_space<smem>>
    %289 = arith.index_cast %288 : i32 to index
    %c0_100 = arith.constant 0 : index
    %290 = vector.load %arg2[%289, %c0_100] : memref<32x128xf32, #tpu.memory_space<vmem>>, vector<1x128xf32>
    %291 = arith.addf %285, %290 : vector<1x128xf32>
    %c4_i32_101 = arith.constant 4 : i32
    %292 = arith.addi %266, %c4_i32_101 : i32
    %293 = arith.index_cast %292 : i32 to index
    %294 = memref.load %arg1[%293] : memref<64xi32, #tpu.memory_space<smem>>
    %295 = arith.index_cast %294 : i32 to index
    %c0_102 = arith.constant 0 : index
    %296 = vector.load %arg2[%295, %c0_102] : memref<32x128xf32, #tpu.memory_space<vmem>>, vector<1x128xf32>
    %297 = arith.addf %291, %296 : vector<1x128xf32>
    %c5_i32_103 = arith.constant 5 : i32
    %298 = arith.addi %266, %c5_i32_103 : i32
    %299 = arith.index_cast %298 : i32 to index
    %300 = memref.load %arg1[%299] : memref<64xi32, #tpu.memory_space<smem>>
    %301 = arith.index_cast %300 : i32 to index
    %c0_104 = arith.constant 0 : index
    %302 = vector.load %arg2[%301, %c0_104] : memref<32x128xf32, #tpu.memory_space<vmem>>, vector<1x128xf32>
    %303 = arith.addf %297, %302 : vector<1x128xf32>
    %c6_i32_105 = arith.constant 6 : i32
    %304 = arith.addi %266, %c6_i32_105 : i32
    %305 = arith.index_cast %304 : i32 to index
    %306 = memref.load %arg1[%305] : memref<64xi32, #tpu.memory_space<smem>>
    %307 = arith.index_cast %306 : i32 to index
    %c0_106 = arith.constant 0 : index
    %308 = vector.load %arg2[%307, %c0_106] : memref<32x128xf32, #tpu.memory_space<vmem>>, vector<1x128xf32>
    %309 = arith.addf %303, %308 : vector<1x128xf32>
    %c7_i32_107 = arith.constant 7 : i32
    %310 = arith.addi %266, %c7_i32_107 : i32
    %311 = arith.index_cast %310 : i32 to index
    %312 = memref.load %arg1[%311] : memref<64xi32, #tpu.memory_space<smem>>
    %313 = arith.index_cast %312 : i32 to index
    %c0_108 = arith.constant 0 : index
    %314 = vector.load %arg2[%313, %c0_108] : memref<32x128xf32, #tpu.memory_space<vmem>>, vector<1x128xf32>
    %315 = arith.addf %309, %314 : vector<1x128xf32>
    %c8_i32_109 = arith.constant 8 : i32
    %cst_110 = arith.constant 1.250000e-01 : f32
    %316 = vector.broadcast %cst_110 : f32 to vector<1x128xf32>
    %317 = arith.mulf %315, %316 : vector<1x128xf32>
    %c5 = arith.constant 5 : index
    %c0_111 = arith.constant 0 : index
    %318 = vector.load %arg6[%c5, %c0_111] : memref<8x128xf32, #tpu.memory_space<vmem>>, vector<1x128xf32>
    tpu.vector_store %arg6[%c5, %c0_111], %317 {strides = array<i32>} : memref<8x128xf32, #tpu.memory_space<vmem>>, vector<1x128xf32>,
    %c48_i32 = arith.constant 48 : i32
    %319 = arith.addi %0, %c48_i32 : i32
    %cst_112 = arith.constant 0.000000e+00 : f32
    %320 = vector.broadcast %cst_112 : f32 to vector<1x128xf32>
    %c0_i32_113 = arith.constant 0 : i32
    %321 = arith.addi %319, %c0_i32_113 : i32
    %322 = arith.index_cast %321 : i32 to index
    %323 = memref.load %arg1[%322] : memref<64xi32, #tpu.memory_space<smem>>
    %324 = arith.index_cast %323 : i32 to index
    %c0_114 = arith.constant 0 : index
    %325 = vector.load %arg2[%324, %c0_114] : memref<32x128xf32, #tpu.memory_space<vmem>>, vector<1x128xf32>
    %326 = arith.addf %320, %325 : vector<1x128xf32>
    %c1_i32_115 = arith.constant 1 : i32
    %327 = arith.addi %319, %c1_i32_115 : i32
    %328 = arith.index_cast %327 : i32 to index
    %329 = memref.load %arg1[%328] : memref<64xi32, #tpu.memory_space<smem>>
    %330 = arith.index_cast %329 : i32 to index
    %c0_116 = arith.constant 0 : index
    %331 = vector.load %arg2[%330, %c0_116] : memref<32x128xf32, #tpu.memory_space<vmem>>, vector<1x128xf32>
    %332 = arith.addf %326, %331 : vector<1x128xf32>
    %c2_i32_117 = arith.constant 2 : i32
    %333 = arith.addi %319, %c2_i32_117 : i32
    %334 = arith.index_cast %333 : i32 to index
    %335 = memref.load %arg1[%334] : memref<64xi32, #tpu.memory_space<smem>>
    %336 = arith.index_cast %335 : i32 to index
    %c0_118 = arith.constant 0 : index
    %337 = vector.load %arg2[%336, %c0_118] : memref<32x128xf32, #tpu.memory_space<vmem>>, vector<1x128xf32>
    %338 = arith.addf %332, %337 : vector<1x128xf32>
    %c3_i32_119 = arith.constant 3 : i32
    %339 = arith.addi %319, %c3_i32_119 : i32
    %340 = arith.index_cast %339 : i32 to index
    %341 = memref.load %arg1[%340] : memref<64xi32, #tpu.memory_space<smem>>
    %342 = arith.index_cast %341 : i32 to index
    %c0_120 = arith.constant 0 : index
    %343 = vector.load %arg2[%342, %c0_120] : memref<32x128xf32, #tpu.memory_space<vmem>>, vector<1x128xf32>
    %344 = arith.addf %338, %343 : vector<1x128xf32>
    %c4_i32_121 = arith.constant 4 : i32
    %345 = arith.addi %319, %c4_i32_121 : i32
    %346 = arith.index_cast %345 : i32 to index
    %347 = memref.load %arg1[%346] : memref<64xi32, #tpu.memory_space<smem>>
    %348 = arith.index_cast %347 : i32 to index
    %c0_122 = arith.constant 0 : index
    %349 = vector.load %arg2[%348, %c0_122] : memref<32x128xf32, #tpu.memory_space<vmem>>, vector<1x128xf32>
    %350 = arith.addf %344, %349 : vector<1x128xf32>
    %c5_i32_123 = arith.constant 5 : i32
    %351 = arith.addi %319, %c5_i32_123 : i32
    %352 = arith.index_cast %351 : i32 to index
    %353 = memref.load %arg1[%352] : memref<64xi32, #tpu.memory_space<smem>>
    %354 = arith.index_cast %353 : i32 to index
    %c0_124 = arith.constant 0 : index
    %355 = vector.load %arg2[%354, %c0_124] : memref<32x128xf32, #tpu.memory_space<vmem>>, vector<1x128xf32>
    %356 = arith.addf %350, %355 : vector<1x128xf32>
    %c6_i32_125 = arith.constant 6 : i32
    %357 = arith.addi %319, %c6_i32_125 : i32
    %358 = arith.index_cast %357 : i32 to index
    %359 = memref.load %arg1[%358] : memref<64xi32, #tpu.memory_space<smem>>
    %360 = arith.index_cast %359 : i32 to index
    %c0_126 = arith.constant 0 : index
    %361 = vector.load %arg2[%360, %c0_126] : memref<32x128xf32, #tpu.memory_space<vmem>>, vector<1x128xf32>
    %362 = arith.addf %356, %361 : vector<1x128xf32>
    %c7_i32_127 = arith.constant 7 : i32
    %363 = arith.addi %319, %c7_i32_127 : i32
    %364 = arith.index_cast %363 : i32 to index
    %365 = memref.load %arg1[%364] : memref<64xi32, #tpu.memory_space<smem>>
    %366 = arith.index_cast %365 : i32 to index
    %c0_128 = arith.constant 0 : index
    %367 = vector.load %arg2[%366, %c0_128] : memref<32x128xf32, #tpu.memory_space<vmem>>, vector<1x128xf32>
    %368 = arith.addf %362, %367 : vector<1x128xf32>
    %c8_i32_129 = arith.constant 8 : i32
    %cst_130 = arith.constant 1.250000e-01 : f32
    %369 = vector.broadcast %cst_130 : f32 to vector<1x128xf32>
    %370 = arith.mulf %368, %369 : vector<1x128xf32>
    %c6 = arith.constant 6 : index
    %c0_131 = arith.constant 0 : index
    %371 = vector.load %arg6[%c6, %c0_131] : memref<8x128xf32, #tpu.memory_space<vmem>>, vector<1x128xf32>
    tpu.vector_store %arg6[%c6, %c0_131], %370 {strides = array<i32>} : memref<8x128xf32, #tpu.memory_space<vmem>>, vector<1x128xf32>,
    %c56_i32 = arith.constant 56 : i32
    %372 = arith.addi %0, %c56_i32 : i32
    %cst_132 = arith.constant 0.000000e+00 : f32
    %373 = vector.broadcast %cst_132 : f32 to vector<1x128xf32>
    %c0_i32_133 = arith.constant 0 : i32
    %374 = arith.addi %372, %c0_i32_133 : i32
    %375 = arith.index_cast %374 : i32 to index
    %376 = memref.load %arg1[%375] : memref<64xi32, #tpu.memory_space<smem>>
    %377 = arith.index_cast %376 : i32 to index
    %c0_134 = arith.constant 0 : index
    %378 = vector.load %arg2[%377, %c0_134] : memref<32x128xf32, #tpu.memory_space<vmem>>, vector<1x128xf32>
    %379 = arith.addf %373, %378 : vector<1x128xf32>
    %c1_i32_135 = arith.constant 1 : i32
    %380 = arith.addi %372, %c1_i32_135 : i32
    %381 = arith.index_cast %380 : i32 to index
    %382 = memref.load %arg1[%381] : memref<64xi32, #tpu.memory_space<smem>>
    %383 = arith.index_cast %382 : i32 to index
    %c0_136 = arith.constant 0 : index
    %384 = vector.load %arg2[%383, %c0_136] : memref<32x128xf32, #tpu.memory_space<vmem>>, vector<1x128xf32>
    %385 = arith.addf %379, %384 : vector<1x128xf32>
    %c2_i32_137 = arith.constant 2 : i32
    %386 = arith.addi %372, %c2_i32_137 : i32
    %387 = arith.index_cast %386 : i32 to index
    %388 = memref.load %arg1[%387] : memref<64xi32, #tpu.memory_space<smem>>
    %389 = arith.index_cast %388 : i32 to index
    %c0_138 = arith.constant 0 : index
    %390 = vector.load %arg2[%389, %c0_138] : memref<32x128xf32, #tpu.memory_space<vmem>>, vector<1x128xf32>
    %391 = arith.addf %385, %390 : vector<1x128xf32>
    %c3_i32_139 = arith.constant 3 : i32
    %392 = arith.addi %372, %c3_i32_139 : i32
    %393 = arith.index_cast %392 : i32 to index
    %394 = memref.load %arg1[%393] : memref<64xi32, #tpu.memory_space<smem>>
    %395 = arith.index_cast %394 : i32 to index
    %c0_140 = arith.constant 0 : index
    %396 = vector.load %arg2[%395, %c0_140] : memref<32x128xf32, #tpu.memory_space<vmem>>, vector<1x128xf32>
    %397 = arith.addf %391, %396 : vector<1x128xf32>
    %c4_i32_141 = arith.constant 4 : i32
    %398 = arith.addi %372, %c4_i32_141 : i32
    %399 = arith.index_cast %398 : i32 to index
    %400 = memref.load %arg1[%399] : memref<64xi32, #tpu.memory_space<smem>>
    %401 = arith.index_cast %400 : i32 to index
    %c0_142 = arith.constant 0 : index
    %402 = vector.load %arg2[%401, %c0_142] : memref<32x128xf32, #tpu.memory_space<vmem>>, vector<1x128xf32>
    %403 = arith.addf %397, %402 : vector<1x128xf32>
    %c5_i32_143 = arith.constant 5 : i32
    %404 = arith.addi %372, %c5_i32_143 : i32
    %405 = arith.index_cast %404 : i32 to index
    %406 = memref.load %arg1[%405] : memref<64xi32, #tpu.memory_space<smem>>
    %407 = arith.index_cast %406 : i32 to index
    %c0_144 = arith.constant 0 : index
    %408 = vector.load %arg2[%407, %c0_144] : memref<32x128xf32, #tpu.memory_space<vmem>>, vector<1x128xf32>
    %409 = arith.addf %403, %408 : vector<1x128xf32>
    %c6_i32_145 = arith.constant 6 : i32
    %410 = arith.addi %372, %c6_i32_145 : i32
    %411 = arith.index_cast %410 : i32 to index
    %412 = memref.load %arg1[%411] : memref<64xi32, #tpu.memory_space<smem>>
    %413 = arith.index_cast %412 : i32 to index
    %c0_146 = arith.constant 0 : index
    %414 = vector.load %arg2[%413, %c0_146] : memref<32x128xf32, #tpu.memory_space<vmem>>, vector<1x128xf32>
    %415 = arith.addf %409, %414 : vector<1x128xf32>
    %c7_i32_147 = arith.constant 7 : i32
    %416 = arith.addi %372, %c7_i32_147 : i32
    %417 = arith.index_cast %416 : i32 to index
    %418 = memref.load %arg1[%417] : memref<64xi32, #tpu.memory_space<smem>>
    %419 = arith.index_cast %418 : i32 to index
    %c0_148 = arith.constant 0 : index
    %420 = vector.load %arg2[%419, %c0_148] : memref<32x128xf32, #tpu.memory_space<vmem>>, vector<1x128xf32>
    %421 = arith.addf %415, %420 : vector<1x128xf32>
    %c8_i32_149 = arith.constant 8 : i32
    %cst_150 = arith.constant 1.250000e-01 : f32
    %422 = vector.broadcast %cst_150 : f32 to vector<1x128xf32>
    %423 = arith.mulf %421, %422 : vector<1x128xf32>
    %c7 = arith.constant 7 : index
    %c0_151 = arith.constant 0 : index
    %424 = vector.load %arg6[%c7, %c0_151] : memref<8x128xf32, #tpu.memory_space<vmem>>, vector<1x128xf32>
    tpu.vector_store %arg6[%c7, %c0_151], %423 {strides = array<i32>} : memref<8x128xf32, #tpu.memory_space<vmem>>, vector<1x128xf32>,
    %c0_152 = arith.constant 0 : index
    %c0_153 = arith.constant 0 : index
    %425 = vector.load %arg6[%c0_152, %c0_153] : memref<8x128xf32, #tpu.memory_space<vmem>>, vector<8x128xf32>
    %c0_154 = arith.constant 0 : index
    %c0_155 = arith.constant 0 : index
    %426 = vector.load %arg3[%c0_154, %c0_155] : memref<128x128xf32, #tpu.memory_space<vmem>>, vector<128x128xf32>
    %cst_156 = arith.constant dense<0.000000e+00> : vector<8x128xf32>
    %427 = tpu.matmul %425, %426, %cst_156 {dimension_numbers = #tpu.dot_dimension_numbers<[1], [0], [0], [1], [0, 0, 1, 1], [], []>} : vector<8x128xf32>, vector<128x128xf32>, vector<8x128xf32> -> vector<8x128xf32>
    %c0_157 = arith.constant 0 : index
    %c0_158 = arith.constant 0 : index
    %428 = vector.load %arg4[%c0_157, %c0_158] : memref<1x128xf32, #tpu.memory_space<vmem>>, vector<1x128xf32>
    %429 = vector.broadcast %428 : vector<1x128xf32> to vector<8x128xf32>
    %430 = arith.addf %427, %429 : vector<8x128xf32>
    %c0_159 = arith.constant 0 : index
    %c0_160 = arith.constant 0 : index
    %431 = vector.load %arg5[%c0_159, %c0_160] : memref<8x128xf32, #tpu.memory_space<vmem>>, vector<8x128xf32>
    tpu.vector_store %arg5[%c0_159, %c0_160], %430 {strides = array<i32>} : memref<8x128xf32, #tpu.memory_space<vmem>>, vector<8x128xf32>,
    return
  }
  func.func @transform_0(%arg0: i32, %arg1: memref<64xi32, #tpu.memory_space<smem>>) -> (i32, i32) {
    %c0_i32 = arith.constant 0 : i32
    %c0_i32_0 = arith.constant 0 : i32
    %c0_i32_1 = arith.constant 0 : i32
    return %c0_i32, %c0_i32_0 : i32, i32
  }
  func.func @transform_1(%arg0: i32, %arg1: memref<64xi32, #tpu.memory_space<smem>>) -> (i32, i32) {
    %c0_i32 = arith.constant 0 : i32
    %c0_i32_0 = arith.constant 0 : i32
    %c0_i32_1 = arith.constant 0 : i32
    return %c0_i32, %c0_i32_0 : i32, i32
  }
  func.func @transform_2(%arg0: i32, %arg1: memref<64xi32, #tpu.memory_space<smem>>) -> (i32, i32) {
    %c0_i32 = arith.constant 0 : i32
    %c0_i32_0 = arith.constant 0 : i32
    %c0_i32_1 = arith.constant 0 : i32
    return %c0_i32, %c0_i32_0 : i32, i32
  }
  func.func @transform_3(%arg0: i32, %arg1: memref<64xi32, #tpu.memory_space<smem>>) -> (i32, i32) {
    %c0_i32 = arith.constant 0 : i32
    %c0_i32_0 = arith.constant 0 : i32
    return %arg0, %c0_i32 : i32, i32
  }
}

</mosaic_0001>

<bundles_post_ra>
// kernel: fasttext_forward.1
= control target key start
LH: loop header
LB: loop body
LE: loop exit
PB: predicated region body
PF: predicated region fallthrough
CT: control target
= control target key end

     0   :  { %s963_s0 = inlined_call_operand.vmem [shape: s32[64], index: 0, kind: input, shape index: {}]   ;;  %s964_s1 = inlined_call_operand.hbm [shape: f32[32,128], index: 1, kind: input, shape index: {}]   ;;  %s965_s2 = inlined_call_operand.hbm [shape: f32[128,128], index: 2, kind: input, shape index: {}]   ;;  %s966_s3 = inlined_call_operand.vmem [shape: f32[1,128], index: 3, kind: input, shape index: {}]   ;;  %s967_s4 = inlined_call_operand.vmem [shape: f32[8,128], index: 4, kind: output, shape index: {}]  }
   0x1   :  { %s9_s17 = sshll.u32 %s963_s0, 4  ;;  %s10_s17 = int_to_ptr.vmem [resolvable:$true] %s9_s17 }
   0x2   :  { %s698_s18 = scalar_lea.vmem %s10_s17, 16  ;;  %p703_p1 = scmp.lt.s32.totalorder %s10_s17, %s10_s17 }
   0x3   :  { %p699_p0 = scmp.ne.s32.totalorder %s10_s17, %s698_s18  ;;  %p704_p2 = scmp.lt.s32.totalorder %s698_s18, %s698_s18 }
   0x5   :  { %p705_p3 = por %p704_p2, %p703_p1 }
   0x7   :  { %p706_p4 = pnand %p705_p3, %p699_p0 }
   0x9   :  { %709 = shalt.err (!%p706_p4)  }
   0xa   :  { %s760_s19 = smov [#allocation4]  }
   0xb   :  { %12 = dma.vmem_to_smem %s10_s17, 16, %s760_s19, [#allocation3] }
   0xc   :  { %754 = dma.done.wait [#allocation3], 16 }
   0xd   :  { %755 = vsyncadd [#allocation3], 4294967280 }
   0xe   :  { %14 = sfence }
   0xf   :  { %15 = vsyncpa [#allocation6], 0 }
  0x10   :  { %16 = vsyncpa [#allocation8], 0  ;;  %s761_s20 = smov [#allocation5]   ;;  %s710_s23 = scalar_lea.hbm %s964_s1, 512 }
  0x11   :  { %s22_s21 = sshll.u32 %s761_s20, 4  ;;  %p711_p5 = scmp.ne.s32.totalorder %s964_s1, %s710_s23  ;;  %s23_s21 = int_to_ptr.vmem [resolvable:$true] %s22_s21 }
  0x12   :  { %p714_p6 = scmp.lt.u32.totalorder %s710_s23, %s964_s1 }
  0x14   :  { %p716_p7 = pnand %p714_p6, %p711_p5 }
  0x16   :  { %719 = shalt.err (!%p716_p7)
}
  0x17   :  { %s720_s28 = scalar_lea.vmem %s23_s21, 512  ;;  %p725_p9 = scmp.lt.s32.totalorder %s23_s21, %s23_s21 }
  0x18   :  { %p721_p8 = scmp.ne.s32.totalorder %s23_s21, %s720_s28  ;;  %p726_p10 = scmp.lt.s32.totalorder %s720_s28, %s720_s28 }
  0x1a   :  { %p727_p11 = por %p726_p10, %p725_p9 }
  0x1c   :  { %p728_p12 = pnand %p727_p11, %p721_p8 }
  0x1e   :  { %731 = shalt.err (!%p728_p12)
}
  0x1f   :  { %s762_s29 = smov 128   ;;  %s763_s30 = smov 8  }
  0x20   :  { %28 = dma.hbm_to_vmem [thread:$0]  %s964_s1, 512, %s23_s21, [#allocation6], %s762_s29, %s762_s29, %s763_s30  }
  0x21   :  { %s764_s7 = smov [#allocation7]   ;;  %s732_s11 = scalar_lea.hbm %s965_s2, 2048 }
  0x22   :  { %s34_s8 = sshll.u32 %s764_s7, 4  ;;  %p733_p13 = scmp.ne.s32.totalorder %s965_s2, %s732_s11  ;;  %s35_s8 = int_to_ptr.vmem [resolvable:$true] %s34_s8 }
  0x23   :  { %p736_p0 = scmp.lt.u32.totalorder %s732_s11, %s965_s2 }
  0x25   :  { %p738_p1 = pnand %p736_p0, %p733_p13 }
  0x27   :  { %741 = shalt.err (!%p738_p1)
}
  0x28   :  { %s742_s16 = scalar_lea.vmem %s35_s8, 2048  ;;  %p747_p3 = scmp.lt.s32.totalorder %s35_s8, %s35_s8 }
  0x29   :  { %p743_p2 = scmp.ne.s32.totalorder %s35_s8, %s742_s16  ;;  %p748_p4 = scmp.lt.s32.totalorder %s742_s16, %s742_s16 }
  0x2b   :  { %p749_p5 = por %p748_p4, %p747_p3 }
  0x2d   :  { %p750_p6 = pnand %p749_p5, %p743_p2 }
  0x2f   :  { %753 = shalt.err (!%p750_p6)
}
  0x30   :  { %40 = dma.hbm_to_vmem [thread:$0]  %s965_s2, 2048, %s35_s8, [#allocation8], %s762_s29, %s762_s29, %s763_s30  }
  0x31   :  { %756 = dma.done.wait [#allocation6], 512  }
  0x32   :  { %757 = vsyncadd [#allocation6], 4294966784 }
  0x33   :  { %758 = dma.done.wait [#allocation8], 2048  }
  0x34   :  { %759 = vsyncadd [#allocation8], 4294965248  ;;  %v765_v0 = vmov 0.0|0.0   ;;  %vm766_vm0 = vmmov 0   ;;  %v767_v1 = vmov 0.0   ;;  %s50_s18 = sld [smem:[#allocation4]] }
  0x35   :  { %666 = vmatprep.subr.bf16.mxu0 %v765_v0  ;;  %663 = vmatprep.mubr.msk.f32.mxu0 %vm766_vm0, %v767_v1  ;;  %s550_s19 = sld [smem:[#allocation4 + $0x1]]  ;;  %s551_s20 = sld [smem:[#allocation4 + $0x2]]  ;;  %v386_v2 = vld [vmem:[#allocation7] sm:$0xff]  ;;  %v387_v3 = vld [vmem:[#allocation7 + $0x8] sm:$0xff]  ;;  %v388_v4 = vld [vmem:[#allocation7 + $0x10] sm:$0xff] }
  0x36   :  { %s821_s21 = sld [smem:[#allocation4 + $0x3]]  ;;  %s823_s22 = sld [smem:[#allocation4 + $0x4]]  ;;  %v667_v5 = vpack.c.bf16 %v387_v3, %v386_v2  ;;  %v389_v6 = vld [vmem:[#allocation7 + $0x18] sm:$0xff]  ;;  %v390_v8 = vld [vmem:[#allocation7 + $0x20] sm:$0xff]  ;;  %v391_v9 = vld [vmem:[#allocation7 + $0x28] sm:$0xff] }
  0x37   :  { %s825_s0 = sld [smem:[#allocation4 + $0x5]]  ;;  %s827_s2 = sld [smem:[#allocation4 + $0x6]]  ;;  %v670_v7 = vpack.c.bf16 %v389_v6, %v388_v4  ;;  %v673_v14 = vpack.c.bf16 %v391_v9, %v390_v8  ;;  %v392_v15 = vld [vmem:[#allocation7 + $0x30] sm:$0xff]  ;;  %v393_v16 = vld [vmem:[#allocation7 + $0x38] sm:$0xff]  ;;  %v394_v29 = vld [vmem:[#allocation7 + $0x40] sm:$0xff] }
  0x38   :  { %s829_s23 = sld [smem:[#allocation4 + $0x8]]  ;;  %s831_s24 = sld [smem:[#allocation4 + $0x9]]  ;;  %668 = vmatpush3.bf16.msra.mxu0 %v667_v5  ;;  %v676_v26 = vpack.c.bf16 %v393_v16, %v392_v15  ;;  %v395_v30 = vld [vmem:[#allocation7 + $0x48] sm:$0xff]  ;;  %v396_v37 = vld [vmem:[#allocation7 + $0x50] sm:$0xff]  ;;  %v397_v38 = vld [vmem:[#allocation7 + $0x58] sm:$0xff] }
  0x39   :  { %s833_s25 = sld [smem:[#allocation4 + $0x7]]  ;;  %s835_s26 = sld [smem:[#allocation4 + $0xa]]  ;;  %669 = vmatprep.subr.bf16.mxu0 %v765_v0  ;;  %v679_v35 = vpack.c.bf16 %v395_v30, %v394_v29  ;;  %v682_v46 = vpack.c.bf16 %v397_v38, %v396_v37  ;;  %v398_v50 = vld [vmem:[#allocation7 + $0x60] sm:$0xff]  ;;  %v399_v51 = vld [vmem:[#allocation7 + $0x68] sm:$0xff]  ;;  %v400_v57 = vld [vmem:[#allocation7 + $0x70] sm:$0xff] }
  0x3a   :  { %s837_s27 = sld [smem:[#allocation4 + $0xb]]  ;;  %s51_s28 = scalar_lea.vmem [#allocation5], %s50_s18  ;;  %v401_v58 = vld [vmem:[#allocation7 + $0x78] sm:$0xff]  ;;  %v685_v60 = vpack.c.bf16 %v399_v51, %v398_v50 }
  0x3b   :  { %v52_v10 = vld [vmem:[%s51_s28] sm:$0x1]  ;;  %s56_s29 = scalar_lea.vmem [#allocation5], %s550_s19  ;;  %s61_s30 = scalar_lea.vmem [#allocation5], %s551_s20  ;;  %v688_v4 = vpack.c.bf16 %v401_v58, %v400_v57 }
  0x3c   :  { %v57_v11 = vld [vmem:[%s56_s29] sm:$0x1]  ;;  %671 = vmatpush3.bf16.msra.mxu0 %v670_v7  ;;  %s66_s5 = scalar_lea.vmem [#allocation5], %s821_s21  ;;  %s71_s9 = scalar_lea.vmem [#allocation5], %s823_s22 }
  0x3d   :  { %v58_v12 = vadd.f32 %v57_v11, %v52_v10  ;;  %v62_v13 = vld [vmem:[%s61_s30] sm:$0x1]  ;;  %672 = vmatprep.subr.bf16.mxu0 %v765_v0  ;;  %s846_s10 = sld [smem:[#allocation4 + $0xc]]  ;;  %s849_s12 = sld [smem:[#allocation4 + $0xd]] }
  0x3e   :  { %v67_v17 = vld [vmem:[%s66_s5] sm:$0x1]  ;;  %s93_s6 = scalar_lea.vmem [#allocation5], %s829_s23  ;;  %s98_s7 = scalar_lea.vmem [#allocation5], %s831_s24 }
  0x3f   :  { %v63_v18 = vadd.f32 %v62_v13, %v58_v12  ;;  %v94_v19 = vld [vmem:[%s93_s6] sm:$0x1]  ;;  %s103_s8 = scalar_lea.vmem [#allocation5], %s835_s26  ;;  %s851_s13 = sld [smem:[#allocation4 + $0xe]] }
  0x40   :  { %v99_v20 = vld [vmem:[%s98_s7] sm:$0x1]  ;;  %s108_s11 = scalar_lea.vmem [#allocation5], %s837_s27  ;;  %674 = vmatpush3.bf16.msra.mxu0 %v673_v14  ;;  %s76_s14 = scalar_lea.vmem [#allocation5], %s825_s0 }
  0x41   :  { %v104_v21 = vld [vmem:[%s103_s8] sm:$0x1]  ;;  %v100_v23 = vadd.f32 %v99_v20, %v94_v19  ;;  %v68_v24 = vadd.f32 %v67_v17, %v63_v18  ;;  %s854_s15 = sld [smem:[#allocation4 + $0xf]]  ;;  %s856_s16 = sld [smem:[#allocation4 + $0x10]]  ;;  %675 = vmatprep.subr.bf16.mxu0 %v765_v0 }
  0x42   :  { %v72_v22 = vld [vmem:[%s71_s9] sm:$0x1]  ;;  %s859_s1 = sld [smem:[#allocation4 + $0x11]]  ;;  %s861_s17 = sld [smem:[#allocation4 + $0x12]] }
  0x43   :  { %v109_v25 = vld [vmem:[%s108_s11] sm:$0x1]  ;;  %v105_v28 = vadd.f32 %v104_v21, %v100_v23  ;;  %v73_v31 = vadd.f32 %v72_v22, %v68_v24  ;;  %s81_s18 = scalar_lea.vmem [#allocation5], %s827_s2  ;;  %s864_s19 = sld [smem:[#allocation4 + $0x13]] }
  0x44   :  { %v77_v27 = vld [vmem:[%s76_s14] sm:$0x1]  ;;  %s866_s20 = sld [smem:[#allocation4 + $0x14]]  ;;  %s868_s21 = sld [smem:[#allocation4 + $0x15]]  ;;  %677 = vmatpush3.bf16.msra.mxu0 %v676_v26 }
  0x45   :  { %v82_v32 = vld [vmem:[%s81_s18] sm:$0x1]  ;;  %v110_v33 = vadd.f32 %v109_v25, %v105_v28  ;;  %v78_v34 = vadd.f32 %v77_v27, %v73_v31  ;;  %s870_s22 = sld [smem:[#allocation4 + $0x16]]  ;;  %s86_s0 = scalar_lea.vmem [#allocation5], %s833_s25  ;;  %678 = vmatprep.subr.bf16.mxu0 %v765_v0 }
  0x46   :  { %v87_v36 = vld [vmem:[%s86_s0] sm:$0x1]  ;;  %s873_s2 = sld [smem:[#allocation4 + $0x17]]  ;;  %s113_s23 = scalar_lea.vmem [#allocation5], %s846_s10 }
  0x47   :  { %v83_v39 = vadd.f32 %v82_v32, %v78_v34  ;;  %v114_v40 = vld [vmem:[%s113_s23] sm:$0x1]  ;;  %s118_s24 = scalar_lea.vmem [#allocation5], %s849_s12  ;;  %s123_s26 = scalar_lea.vmem [#allocation5], %s851_s13 }
  0x48   :  { %v115_v41 = vadd.f32 %v114_v40, %v110_v33  ;;  %v119_v42 = vld [vmem:[%s118_s24] sm:$0x1]  ;;  %s135_s25 = scalar_lea.vmem [#allocation5], %s856_s16  ;;  %680 = vmatpush3.bf16.msra.mxu0 %v679_v35  ;;  %s140_s27 = scalar_lea.vmem [#allocation5], %s859_s1 }
  0x49   :  { %v88_v43 = vadd.f32 %v87_v36, %v83_v39  ;;  %v124_v44 = vld [vmem:[%s123_s26] sm:$0x1]  ;;  %s145_s28 = scalar_lea.vmem [#allocation5], %s861_s17  ;;  %681 = vmatprep.subr.bf16.mxu0 %v765_v0  ;;  %s128_s29 = scalar_lea.vmem [#allocation5], %s854_s15 }
  0x4a   :  { %v136_v45 = vld [vmem:[%s135_s25] sm:$0x1]  ;;  %v120_v47 = vadd.f32 %v119_v42, %v115_v41  ;;  %s150_s30 = scalar_lea.vmem [#allocation5], %s864_s19  ;;  %s885_s5 = sld [smem:[#allocation4 + $0x18]] }
  0x4b   :  { %v141_v48 = vld [vmem:[%s140_s27] sm:$0x1]  ;;  %v89_v52 = vmul.f32 0.125, %v88_v43  ;;  %s155_s6 = scalar_lea.vmem [#allocation5], %s866_s20  ;;  %s888_s7 = sld [smem:[#allocation4 + $0x19]] }
  0x4c   :  { %v146_v49 = vld [vmem:[%s145_s28] sm:$0x1]  ;;  %v142_v54 = vadd.f32 %v141_v48, %v136_v45  ;;  %v125_v55 = vadd.f32 %v124_v44, %v120_v47  ;;  %683 = vmatpush3.bf16.msra.mxu0 %v682_v46  ;;  %s890_s8 = sld [smem:[#allocation4 + $0x1a]]  ;;  %s160_s9 = scalar_lea.vmem [#allocation5], %s868_s21 }
  0x4d   :  { %v129_v53 = vld [vmem:[%s128_s29] sm:$0x1]  ;;  %90 = vst [vmem:[#allocation2] sm:$0x1] %v89_v52  ;;  %684 = vmatprep.subr.bf16.mxu0 %v765_v0  ;;  %s894_s10 = sld [smem:[#allocation4 + $0x1b]]  ;;  %s896_s11 = sld [smem:[#allocation4 + $0x1c]] }
  0x4e   :  { %v151_v56 = vld [vmem:[%s150_s30] sm:$0x1]  ;;  %v147_v59 = vadd.f32 %v146_v49, %v142_v54  ;;  %v130_v61 = vadd.f32 %v129_v53, %v125_v55  ;;  %s898_s12 = sld [smem:[#allocation4 + $0x1d]]  ;;  %s900_s13 = sld [smem:[#allocation4 + $0x1e]] }
  0x4f   :  { %v156_v62 = vld [vmem:[%s155_s6] sm:$0x1]  ;;  %s902_s14 = sld [smem:[#allocation4 + $0x1f]]  ;;  %s904_s15 = sld [smem:[#allocation4 + $0x20]] }
  0x50   :  { %v152_v63 = vadd.f32 %v151_v56, %v147_v59  ;;  %v161_v1 = vld [vmem:[%s160_s9] sm:$0x1]  ;;  %v131_v2 = vmul.f32 0.125, %v130_v61  ;;  %686 = vmatpush3.bf16.msra.mxu0 %v685_v60  ;;  %s165_s16 = scalar_lea.vmem [#allocation5], %s870_s22  ;;  %s582_s1 = sld [smem:[#allocation4 + $0x21]] }
  0x51   :  { %v166_v5 = vld [vmem:[%s165_s16] sm:$0x1]  ;;  %s583_s17 = sld [smem:[#allocation4 + $0x22]]  ;;  %687 = vmatprep.subr.bf16.mxu0 %v765_v0  ;;  %s908_s18 = sld [smem:[#allocation4 + $0x23]] }
  0x52   :  { %v157_v3 = vadd.f32 %v156_v62, %v152_v63  ;;  %132 = vst [vmem:[#allocation2 + $0x1] sm:$0x1] %v131_v2  ;;  %s170_s19 = scalar_lea.vmem [#allocation5], %s873_s2  ;;  %s177_s20 = scalar_lea.vmem [#allocation5], %s885_s5 }
  0x53   :  { %v171_v7 = vld [vmem:[%s170_s19] sm:$0x1]  ;;  %s182_s21 = scalar_lea.vmem [#allocation5], %s888_s7  ;;  %s187_s0 = scalar_lea.vmem [#allocation5], %s890_s8 }
  0x54   :  { %v162_v6 = vadd.f32 %v161_v1, %v157_v3  ;;  %v178_v8 = vld [vmem:[%s177_s20] sm:$0x1]  ;;  %689 = vmatpush3.bf16.msra.mxu0 %v688_v4  ;;  %s192_s22 = scalar_lea.vmem [#allocation5], %s894_s10  ;;  %s197_s23 = scalar_lea.vmem [#allocation5], %s896_s11 }
  0x55   :  { %v183_v10 = vld [vmem:[%s182_s21] sm:$0x1]  ;;  %s219_s2 = scalar_lea.vmem [#allocation5], %s904_s15  ;;  %s202_s25 = scalar_lea.vmem [#allocation5], %s898_s12 }
  0x56   :  { %v167_v9 = vadd.f32 %v166_v5, %v162_v6  ;;  %v188_v11 = vld [vmem:[%s187_s0] sm:$0x1]  ;;  %v184_v12 = vadd.f32 %v183_v10, %v178_v8  ;;  %s224_s24 = scalar_lea.vmem [#allocation5], %s582_s1  ;;  %s585_s27 = sld [smem:[#allocation4 + $0x24]] }
  0x57   :  { %v193_v0 = vld [vmem:[%s192_s22] sm:$0x1]  ;;  %s229_s26 = scalar_lea.vmem [#allocation5], %s583_s17  ;;  %s586_s28 = sld [smem:[#allocation4 + $0x25]] }
  0x58   :  { %v172_v13 = vadd.f32 %v171_v7, %v167_v9  ;;  %v189_v14 = vadd.f32 %v188_v11, %v184_v12  ;;  %v198_v15 = vld [vmem:[%s197_s23] sm:$0x1]  ;;  %s234_s29 = scalar_lea.vmem [#allocation5], %s908_s18  ;;  %s587_s30 = sld [smem:[#allocation4 + $0x26]] }
  0x59   :  { %v220_v16 = vld [vmem:[%s219_s2] sm:$0x1]  ;;  %s919_s5 = sld [smem:[#allocation4 + $0x27]]  ;;  %s589_s6 = sld [smem:[#allocation4 + $0x28]] }
  0x5a   :  { %v173_v17 = vmul.f32 0.125, %v172_v13  ;;  %v225_v18 = vld [vmem:[%s224_s24] sm:$0x1]  ;;  %v194_v20 = vadd.f32 %v193_v0, %v189_v14  ;;  %s590_s7 = sld [smem:[#allocation4 + $0x29]]  ;;  %s207_s8 = scalar_lea.vmem [#allocation5], %s900_s13 }
  0x5b   :  { %v230_v19 = vld [vmem:[%s229_s26] sm:$0x1]  ;;  %v226_v22 = vadd.f32 %v225_v18, %v220_v16  ;;  %s591_s9 = sld [smem:[#allocation4 + $0x2a]]  ;;  %s922_s10 = sld [smem:[#allocation4 + $0x2b]] }
  0x5c   :  { %v203_v21 = vld [vmem:[%s202_s25] sm:$0x1]  ;;  %174 = vst [vmem:[#allocation2 + $0x2] sm:$0x1] %v173_v17  ;;  %v199_v24 = vadd.f32 %v198_v15, %v194_v20  ;;  %s924_s11 = sld [smem:[#allocation4 + $0x2c]]  ;;  %s926_s12 = sld [smem:[#allocation4 + $0x2d]] }
  0x5d   :  { %v235_v23 = vld [vmem:[%s234_s29] sm:$0x1]  ;;  %v231_v25 = vadd.f32 %v230_v19, %v226_v22  ;;  %s212_s15 = scalar_lea.vmem [#allocation5], %s902_s14  ;;  %s929_s16 = sld [smem:[#allocation4 + $0x2e]] }
  0x5e   :  { %v208_v26 = vld [vmem:[%s207_s8] sm:$0x1]  ;;  %v204_v27 = vadd.f32 %v203_v21, %v199_v24  ;;  %s931_s1 = sld [smem:[#allocation4 + $0x2f]]  ;;  %s239_s17 = scalar_lea.vmem [#allocation5], %s585_s27 }
  0x5f   :  { %v236_v28 = vadd.f32 %v235_v23, %v231_v25  ;;  %v213_v29 = vld [vmem:[%s212_s15] sm:$0x1]  ;;  %s244_s13 = scalar_lea.vmem [#allocation5], %s586_s28  ;;  %s249_s18 = scalar_lea.vmem [#allocation5], %s587_s30 }
  0x60   :  { %v209_v30 = vadd.f32 %v208_v26, %v204_v27  ;;  %v240_v31 = vld [vmem:[%s239_s17] sm:$0x1]  ;;  %s261_s19 = scalar_lea.vmem [#allocation5], %s589_s6  ;;  %s266_s14 = scalar_lea.vmem [#allocation5], %s590_s7 }
  0x61   :  { %v245_v32 = vld [vmem:[%s244_s13] sm:$0x1]  ;;  %v241_v34 = vadd.f32 %v240_v31, %v236_v28  ;;  %s271_s20 = scalar_lea.vmem [#allocation5], %s591_s9  ;;  %s254_s21 = scalar_lea.vmem [#allocation5], %s919_s5 }
  0x62   :  { %v214_v33 = vadd.f32 %v213_v29, %v209_v30  ;;  %v250_v35 = vld [vmem:[%s249_s18] sm:$0x1]  ;;  %s276_s0 = scalar_lea.vmem [#allocation5], %s922_s10  ;;  %s281_s22 = scalar_lea.vmem [#allocation5], %s924_s11 }
  0x63   :  { %v262_v36 = vld [vmem:[%s261_s19] sm:$0x1]  ;;  %v246_v39 = vadd.f32 %v245_v32, %v241_v34  ;;  %s597_s23 = sld [smem:[#allocation4 + $0x30]]  ;;  %s598_s2 = sld [smem:[#allocation4 + $0x31]] }
  0x64   :  { %v267_v37 = vld [vmem:[%s266_s14] sm:$0x1]  ;;  %v215_v38 = vmul.f32 0.125, %v214_v33  ;;  %s599_s24 = sld [smem:[#allocation4 + $0x32]]  ;;  %s936_s26 = sld [smem:[#allocation4 + $0x33]] }
  0x65   :  { %v268_v40 = vadd.f32 %v267_v37, %v262_v36  ;;  %v272_v41 = vld [vmem:[%s271_s20] sm:$0x1]  ;;  %v251_v44 = vadd.f32 %v250_v35, %v246_v39  ;;  %s286_s25 = scalar_lea.vmem [#allocation5], %s926_s12  ;;  %s939_s27 = sld [smem:[#allocation4 + $0x34]] }
  0x66   :  { %v255_v42 = vld [vmem:[%s254_s21] sm:$0x1]  ;;  %216 = vst [vmem:[#allocation2 + $0x3] sm:$0x1] %v215_v38  ;;  %s941_s28 = sld [smem:[#allocation4 + $0x35]]  ;;  %s943_s29 = sld [smem:[#allocation4 + $0x36]] }
  0x67   :  { %v277_v43 = vld [vmem:[%s276_s0] sm:$0x1]  ;;  %v273_v45 = vadd.f32 %v272_v41, %v268_v40  ;;  %v256_v47 = vadd.f32 %v255_v42, %v251_v44  ;;  %s945_s30 = sld [smem:[#allocation4 + $0x37]]  ;;  %s291_s5 = scalar_lea.vmem [#allocation5], %s929_s16 }
  0x68   :  { %v282_v46 = vld [vmem:[%s281_s22] sm:$0x1]  ;;  %s605_s6 = sld [smem:[#allocation4 + $0x38]]  ;;  %s606_s7 = sld [smem:[#allocation4 + $0x39]] }
  0x69   :  { %v278_v48 = vadd.f32 %v277_v43, %v273_v45  ;;  %v287_v49 = vld [vmem:[%s286_s25] sm:$0x1]  ;;  %v257_v50 = vmul.f32 0.125, %v256_v47  ;;  %s607_s8 = sld [smem:[#allocation4 + $0x3a]]  ;;  %s948_s9 = sld [smem:[#allocation4 + $0x3b]] }
  0x6a   :  { %v292_v52 = vld [vmem:[%s291_s5] sm:$0x1]  ;;  %s296_s10 = scalar_lea.vmem [#allocation5], %s931_s1  ;;  %s303_s11 = scalar_lea.vmem [#allocation5], %s597_s23 }
  0x6b   :  { %v283_v51 = vadd.f32 %v282_v46, %v278_v48  ;;  %258 = vst [vmem:[#allocation2 + $0x4] sm:$0x1] %v257_v50  ;;  %v297_v54 = vld [vmem:[%s296_s10] sm:$0x1]  ;;  %s308_s12 = scalar_lea.vmem [#allocation5], %s598_s2  ;;  %s313_s15 = scalar_lea.vmem [#allocation5], %s599_s24 }
  0x6c   :  { %v304_v56 = vld [vmem:[%s303_s11] sm:$0x1]  ;;  %s318_s16 = scalar_lea.vmem [#allocation5], %s936_s26  ;;  %s323_s17 = scalar_lea.vmem [#allocation5], %s939_s27 }
  0x6d   :  { %v288_v53 = vadd.f32 %v287_v49, %v283_v51  ;;  %v309_v57 = vld [vmem:[%s308_s12] sm:$0x1]  ;;  %s328_s13 = scalar_lea.vmem [#allocation5], %s941_s28  ;;  %s609_s14 = sld [smem:[#allocation4 + $0x3c]] }
  0x6e   :  { %v310_v58 = vadd.f32 %v309_v57, %v304_v56  ;;  %v314_v59 = vld [vmem:[%s313_s15] sm:$0x1]  ;;  %s345_s1 = scalar_lea.vmem [#allocation5], %s605_s6  ;;  %s350_s18 = scalar_lea.vmem [#allocation5], %s606_s7 }
  0x6f   :  { %v293_v55 = vadd.f32 %v292_v52, %v288_v53  ;;  %v319_v61 = vld [vmem:[%s318_s16] sm:$0x1]  ;;  %s355_s19 = scalar_lea.vmem [#allocation5], %s607_s8  ;;  %s360_s20 = scalar_lea.vmem [#allocation5], %s948_s9 }
  0x70   :  { %v315_v62 = vadd.f32 %v314_v59, %v310_v58  ;;  %v324_v63 = vld [vmem:[%s323_s17] sm:$0x1]  ;;  %s610_s21 = sld [smem:[#allocation4 + $0x3d]]  ;;  %s611_s0 = sld [smem:[#allocation4 + $0x3e]] }
  0x71   :  { %v298_v60 = vadd.f32 %v297_v54, %v293_v55  ;;  %v329_v2 = vld [vmem:[%s328_s13] sm:$0x1]  ;;  %s612_s22 = sld [smem:[#allocation4 + $0x3f]]  ;;  %s333_s23 = scalar_lea.vmem [#allocation5], %s943_s29 }
  0x72   :  { %v346_v3 = vld [vmem:[%s345_s1] sm:$0x1]  ;;  %v320_v5 = vadd.f32 %v319_v61, %v315_v62  ;;  %s338_s2 = scalar_lea.vmem [#allocation5], %s945_s30 }
  0x73   :  { %v299_v1 = vmul.f32 0.125, %v298_v60  ;;  %v351_v4 = vld [vmem:[%s350_s18] sm:$0x1]  ;;  %s365_s24 = scalar_lea.vmem [#allocation5], %s609_s14 }
  0x74   :  { %v352_v6 = vadd.f32 %v351_v4, %v346_v3  ;;  %v356_v7 = vld [vmem:[%s355_s19] sm:$0x1]  ;;  %v325_v9 = vadd.f32 %v324_v63, %v320_v5 }
  0x75   :  { %300 = vst [vmem:[#allocation2 + $0x5] sm:$0x1] %v299_v1  ;;  %v361_v8 = vld [vmem:[%s360_s20] sm:$0x1] }
  0x76   :  { %v357_v10 = vadd.f32 %v356_v7, %v352_v6  ;;  %v334_v11 = vld [vmem:[%s333_s23] sm:$0x1]  ;;  %v330_v12 = vadd.f32 %v329_v2, %v325_v9  ;;  %s370_s26 = scalar_lea.vmem [#allocation5], %s610_s21  ;;  %s375_s25 = scalar_lea.vmem [#allocation5], %s611_s0 }
  0x77   :  { %v339_v0 = vld [vmem:[%s338_s2] sm:$0x1]  ;;  %s380_s27 = scalar_lea.vmem [#allocation5], %s612_s22 }
  0x78   :  { %v362_v13 = vadd.f32 %v361_v8, %v357_v10  ;;  %v335_v14 = vadd.f32 %v334_v11, %v330_v12  ;;  %v366_v15 = vld [vmem:[%s365_s24] sm:$0x1] }
  0x79   :  { %v371_v18 = vld [vmem:[%s370_s26] sm:$0x1] }
  0x7a   :  { %v340_v16 = vadd.f32 %v339_v0, %v335_v14  ;;  %v367_v17 = vadd.f32 %v366_v15, %v362_v13  ;;  %v376_v19 = vld [vmem:[%s375_s25] sm:$0x1] }
  0x7b   :  { %v381_v22 = vld [vmem:[%s380_s27] sm:$0x1] }
  0x7c   :  { %v341_v20 = vmul.f32 0.125, %v340_v16  ;;  %v372_v21 = vadd.f32 %v371_v18, %v367_v17  ;;  %v613_v27 = vld [vmem:[%s966_s3] ss:$0 sm:$0xff] }
  0x7e   :  { %342 = vst [vmem:[#allocation2 + $0x6] sm:$0x1] %v341_v20  ;;  %v377_v23 = vadd.f32 %v376_v19, %v372_v21 }
  0x80   :  { %v382_v24 = vadd.f32 %v381_v22, %v377_v23 }
  0x82   :  { %v383_v25 = vmul.f32 0.125, %v382_v24 }
  0x84   :  { %384 = vst [vmem:[#allocation2 + $0x7] sm:$0x1] %v383_v25 }
  0x8b   :  { %v385_v26 = vld [vmem:[#allocation2] sm:$0xff] }
  0x8c   :  { %664 = vmatmul.mubr.f32.vlgmr.msra.gmra.mrb[0].mxu0 %v385_v26 }
 0x15f   :  { %v475_v28 = vpop.f32.mrb[0].mxu0 }
 0x160   :  { %v476_v29 = vadd.f32 %v613_v27, %v475_v28  ;;  %v665_v30 = vpop.f32.mrb[1].mxu0 }
 0x162   :  { %479 = vst [vmem:[%s967_s4] sm:$0xff] %v476_v29 }
 0x163   :  { %484 = vsyncpa [#allocation6], 1 }
 0x164   :  { %485 = vsyncpa [#allocation8], 1 }

</bundles_post_ra>
